<compile_context>
chip_gen: v7x
topology: tpu7x:2x2x1
jax: 0.10.0
libtpu: 0.0.40
codegen_flags: <defaults>
</compile_context>

<pallas_src>
import jax
import jax.numpy as jnp
from jax.experimental import pallas as pl
from jax.experimental.pallas import tpu as pltpu

EPS = 1e-5  # nn.BatchNorm1d default eps


# ----------------------------------------------------------------------------
# Kernel 1: tiled conv-matmul + ReLU with fused global average pool
# ----------------------------------------------------------------------------
def conv_relu_avgpool(patches, w_flat, b, *, spatial_tile):
    """patches: (N, S, Kp) bf16, w_flat: (Kp, F) bf16, b: (1, F) f32.

    Returns pooled features (N, 1, F) f32 = mean over S of relu(patches@W + b).
    """
    N, S, Kp = patches.shape
    F = w_flat.shape[1]
    assert S % spatial_tile == 0 and spatial_tile % 8 == 0
    n_spatial = S // spatial_tile
    inv_s = 1.0 / S

    def kernel(p_ref, w_ref, b_ref, pooled_ref):
        s = pl.program_id(1)

        @pl.when(s == 0)
        def _():
            pooled_ref[...] = jnp.zeros_like(pooled_ref)

        # (TS, Kp) bf16 @ (Kp, F) bf16 -> f32 on the MXU
        y = jnp.dot(p_ref[0], w_ref[...], preferred_element_type=jnp.float32)
        y = jnp.maximum(y + b_ref[...], 0.0)                       # f32 epilogue
        pooled_ref[0] += jnp.sum(y, axis=0, keepdims=True)          # accumulate

        @pl.when(s == pl.num_programs(1) - 1)
        def _():
            pooled_ref[...] *= inv_s                                # finalize mean

    return pl.pallas_call(
        kernel,
        out_shape=jax.ShapeDtypeStruct((N, 1, F), jnp.float32),
        grid=(N, n_spatial),
        in_specs=[
            pl.BlockSpec((1, spatial_tile, Kp), lambda n, s: (n, s, 0)),
            pl.BlockSpec((Kp, F), lambda n, s: (0, 0)),   # weights resident
            pl.BlockSpec((1, F), lambda n, s: (0, 0)),    # bias resident
        ],
        out_specs=pl.BlockSpec((1, 1, F), lambda n, s: (n, 0, 0)),  # accumulator
        compiler_params=pltpu.CompilerParams(
            dimension_semantics=("parallel", "arbitrary")),
    )(patches, w_flat, b)


# ----------------------------------------------------------------------------
# Kernel 2: fused head = Linear(embed) -> BatchNorm1d (training-mode stats)
# Lane-dense: embed dim is pre-padded to 128; sliced back in the wrapper.
# ----------------------------------------------------------------------------
def embed_batchnorm(pooled, w_embed, b_embed, gamma, beta):
    N, F = pooled.shape
    Ep = w_embed.shape[1]

    def kernel(x_ref, w_ref, b_ref, g_ref, bt_ref, o_ref):
        x = x_ref[...].astype(jnp.bfloat16)                        # bf16 MXU input
        y = jnp.dot(x, w_ref[...], preferred_element_type=jnp.float32)
        y = y + b_ref[...]                                         # Linear bias
        mu = jnp.mean(y, axis=0, keepdims=True)                    # batch mean
        var = jnp.mean((y - mu) ** 2, axis=0, keepdims=True)       # biased var
        y_hat = (y - mu) * jax.lax.rsqrt(var + EPS)
        o_ref[...] = y_hat * g_ref[...] + bt_ref[...]              # affine

    return pl.pallas_call(
        kernel,
        out_shape=jax.ShapeDtypeStruct((N, Ep), jnp.float32),
        in_specs=[pl.BlockSpec(memory_space=pltpu.MemorySpace.VMEM)] * 5,
        out_specs=pl.BlockSpec(memory_space=pltpu.MemorySpace.VMEM),
    )(pooled, w_embed, b_embed, gamma, beta)


# ----------------------------------------------------------------------------
# Glue: im2col for a 3x3 / stride-2 / pad-1 conv (pure data movement in JAX)
# ----------------------------------------------------------------------------
def im2col_3x3_s2(x):
    N, C, H, W = x.shape
    OH, OW = H // 2, W // 2
    xp = jnp.pad(x, ((0, 0), (0, 0), (1, 1), (1, 1)))
    cols = []
    for ki in range(3):
        for kj in range(3):
            cols.append(xp[:, :, ki:ki + 2 * OH:2, kj:kj + 2 * OW:2])
    p = jnp.stack(cols, axis=2)                  # (N, C, 9, OH, OW)
    p = p.transpose(0, 3, 4, 1, 2)               # (N, OH, OW, C, 9)
    return p.reshape(N * OH * OW, C * 9), (N, OH, OW)


def _pad_axis(x, axis, target):
    pad = target - x.shape[axis]
    if pad <= 0:
        return x
    widths = [(0, 0)] * x.ndim
    widths[axis] = (0, pad)
    return jnp.pad(x, widths)


def encoder_cnn_forward(images, params, embed_size, *, spatial_tile=32):
    # images: (N, C, H, W) NCHW float32
    patches, (N, OH, OW) = im2col_3x3_s2(images)
    S = OH * OW
    Kp = params["w_conv"].shape[0]
    patches = _pad_axis(patches, 1, Kp)                 # zero-pad K -> 128
    patches = patches.reshape(N, S, Kp).astype(jnp.bfloat16)

    tile = min(spatial_tile, S)
    pooled = conv_relu_avgpool(patches, params["w_conv"], params["b_conv"],
                               spatial_tile=tile)       # (N, 1, F)
    pooled = pooled.reshape(N, -1)                      # (N, F)

    out = embed_batchnorm(pooled, params["w_embed"], params["b_embed"],
                          params["gamma"], params["beta"])
    return out[:, :embed_size]                          # strip lane padding


# ----------------------------------------------------------------------------
# Plain-JAX reference (identical math incl. bf16 matmul inputs) for sanity
# ----------------------------------------------------------------------------
def reference_forward(images, params, embed_size):
    patches, (N, OH, OW) = im2col_3x3_s2(images)
    Kp = params["w_conv"].shape[0]
    p = _pad_axis(patches, 1, Kp).astype(jnp.bfloat16)
    feat = jnp.dot(p, params["w_conv"], preferred_element_type=jnp.float32)
    feat = jnp.maximum(feat + params["b_conv"], 0.0)
    pooled = feat.reshape(N, OH * OW, -1).mean(axis=1)
    y = jnp.dot(pooled.astype(jnp.bfloat16), params["w_embed"],
                preferred_element_type=jnp.float32) + params["b_embed"]
    mu = y.mean(axis=0, keepdims=True)
    var = ((y - mu) ** 2).mean(axis=0, keepdims=True)
    out = (y - mu) * jax.lax.rsqrt(var + EPS) * params["gamma"] + params["beta"]
    return out[:, :embed_size]


if __name__ == "__main__":
    # Small shapes: batch=2, in-channels=3, spatial=16x16.
    # F_DIM=128 (lane-dense stand-in for resnet.fc.in_features=2048),
    # embed_size=32 (padded to 128 lanes inside the kernels).
    N, C_IN, H, W = 2, 3, 16, 16
    F_DIM, EMBED = 128, 32
    KP, EP = 128, 128

    key = jax.random.PRNGKey(0)
    k_img, k_wc, k_bc, k_we, k_be = jax.random.split(key, 5)

    images = jax.random.normal(k_img, (N, C_IN, H, W), dtype=jnp.float32)

    w_conv = jax.random.normal(k_wc, (F_DIM, C_IN, 3, 3), jnp.float32) * 0.1
    b_conv = jax.random.normal(k_bc, (F_DIM,), jnp.float32) * 0.1
    w_embed = jax.random.normal(k_we, (F_DIM, EMBED), jnp.float32) * 0.1
    b_embed = jax.random.normal(k_be, (EMBED,), jnp.float32) * 0.1
    gamma = jnp.ones((EMBED,), jnp.float32)   # nn.BatchNorm1d default weight
    beta = jnp.zeros((EMBED,), jnp.float32)   # nn.BatchNorm1d default bias

    # (F, C, 3, 3) -> (C*9, F): matches im2col feature ordering (c, ki, kj);
    # K zero-padded to 128, matmul operands in bf16, epilogue params in f32.
    w_conv_flat = _pad_axis(w_conv.reshape(F_DIM, C_IN * 9).T, 0, KP)
    params = {
        "w_conv": w_conv_flat.astype(jnp.bfloat16),                 # (KP, F)
        "b_conv": b_conv.reshape(1, F_DIM),                         # (1, F) f32
        "w_embed": _pad_axis(w_embed, 1, EP).astype(jnp.bfloat16),  # (F, EP)
        "b_embed": _pad_axis(b_embed.reshape(1, EMBED), 1, EP),     # (1, EP) f32
        "gamma": _pad_axis(gamma.reshape(1, EMBED), 1, EP),
        "beta": _pad_axis(beta.reshape(1, EMBED), 1, EP),
    }

    out = encoder_cnn_forward(images, params, EMBED)
    jax.block_until_ready(out)

    ref = reference_forward(images, params, EMBED)
    assert out.shape == (N, EMBED)
    assert jnp.allclose(out, ref, atol=1e-2, rtol=1e-2), (
        float(jnp.max(jnp.abs(out - ref))))

    print("KERNEL_OK")
</pallas_src>

<mosaic_0001>
module attributes {stable_mosaic.version = 11 : i64} {
  func.func @kernel(%arg0: i32, %arg1: i32, %arg2: memref<1x32x128xbf16, #tpu.memory_space<vmem>>, %arg3: memref<128x128xbf16, #tpu.memory_space<vmem>>, %arg4: memref<1x128xf32, #tpu.memory_space<vmem>>, %arg5: memref<1x1x128xf32, #tpu.memory_space<vmem>>) attributes {dimension_semantics = [#tpu.dimension_semantics<parallel>, #tpu.dimension_semantics<arbitrary>], iteration_bounds = array<i64: 2, 2>, scalar_prefetch = 0 : i64, scratch_operands = 0 : i64, tpu.core_type = #tpu.core_type<tc>, window_params = [{transform_indices = @transform_0, window_bounds = array<i64: 1, 32, 128>}, {pipeline_mode = #tpu.pipeline_mode<synchronous>, transform_indices = @transform_1, window_bounds = array<i64: 128, 128>}, {pipeline_mode = #tpu.pipeline_mode<synchronous>, transform_indices = @transform_2, window_bounds = array<i64: 1, 128>}, {transform_indices = @transform_3, window_bounds = array<i64: 1, 1, 128>}]} {
    %c0_i32 = arith.constant 0 : i32
    %0 = arith.cmpi eq, %arg1, %c0_i32 : i32
    %1 = arith.extui %0 : i1 to i32
    %c0_i32_0 = arith.constant 0 : i32
    %2 = arith.cmpi ne, %1, %c0_i32_0 : i32
    scf.if %2 {
      %cst_16 = arith.constant 0.000000e+00 : f32
      %23 = vector.broadcast %cst_16 : f32 to vector<1x1x128xf32>
      %c0_17 = arith.constant 0 : index
      %c0_18 = arith.constant 0 : index
      %c0_19 = arith.constant 0 : index
      %24 = vector.load %arg5[%c0_17, %c0_18, %c0_19] : memref<1x1x128xf32, #tpu.memory_space<vmem>>, vector<1x1x128xf32>
      tpu.vector_store %arg5[%c0_17, %c0_18, %c0_19], %23 {strides = array<i32>} : memref<1x1x128xf32, #tpu.memory_space<vmem>>, vector<1x1x128xf32>,
    } else {
    }
    %c0 = arith.constant 0 : index
    %c0_1 = arith.constant 0 : index
    %c0_2 = arith.constant 0 : index
    %3 = vector.load %arg2[%c0, %c0_1, %c0_2] : memref<1x32x128xbf16, #tpu.memory_space<vmem>>, vector<1x32x128xbf16>
    %4 = vector.shape_cast %3 : vector<1x32x128xbf16> to vector<32x128xbf16>
    %c0_3 = arith.constant 0 : index
    %c0_4 = arith.constant 0 : index
    %5 = vector.load %arg3[%c0_3, %c0_4] : memref<128x128xbf16, #tpu.memory_space<vmem>>, vector<128x128xbf16>
    %cst = arith.constant dense<0.000000e+00> : vector<32x128xf32>
    %6 = tpu.matmul %4, %5, %cst {dimension_numbers = #tpu.dot_dimension_numbers<[1], [0], [0], [1], [0, 0, 1, 1], [], []>} : vector<32x128xbf16>, vector<128x128xbf16>, vector<32x128xf32> -> vector<32x128xf32>
    %c0_5 = arith.constant 0 : index
    %c0_6 = arith.constant 0 : index
    %7 = vector.load %arg4[%c0_5, %c0_6] : memref<1x128xf32, #tpu.memory_space<vmem>>, vector<1x128xf32>
    %8 = vector.broadcast %7 : vector<1x128xf32> to vector<32x128xf32>
    %9 = arith.addf %6, %8 : vector<32x128xf32>
    %cst_7 = arith.constant 0.000000e+00 : f32
    %10 = vector.broadcast %cst_7 : f32 to vector<32x128xf32>
    %11 = arith.maximumf %9, %10 : vector<32x128xf32>
    %c0_8 = arith.constant 0 : index
    %c0_9 = arith.constant 0 : index
    %c0_10 = arith.constant 0 : index
    %12 = vector.load %arg5[%c0_8, %c0_9, %c0_10] : memref<1x1x128xf32, #tpu.memory_space<vmem>>, vector<1x1x128xf32>
    %13 = vector.shape_cast %12 : vector<1x1x128xf32> to vector<1x128xf32>
    %cst_11 = arith.constant dense<0.000000e+00> : vector<128xf32>
    %14 = vector.multi_reduction <add>, %11, %cst_11 [0] : vector<32x128xf32> to vector<128xf32>
    %15 = vector.shape_cast %14 : vector<128xf32> to vector<1x128xf32>
    %16 = arith.addf %13, %15 : vector<1x128xf32>
    %c0_12 = arith.constant 0 : index
    %c0_13 = arith.constant 0 : index
    %c0_14 = arith.constant 0 : index
    %17 = vector.load %arg5[%c0_12, %c0_13, %c0_14] : memref<1x1x128xf32, #tpu.memory_space<vmem>>, vector<1x1x128xf32>
    %18 = vector.shape_cast %17 : vector<1x1x128xf32> to vector<1x128xf32>
    %19 = vector.shape_cast %16 : vector<1x128xf32> to vector<1x1x128xf32>
    tpu.vector_store %arg5[%c0_12, %c0_13, %c0_14], %19 {strides = array<i32>} : memref<1x1x128xf32, #tpu.memory_space<vmem>>, vector<1x1x128xf32>,
    %c1_i32 = arith.constant 1 : i32
    %20 = arith.cmpi eq, %arg1, %c1_i32 : i32
    %21 = arith.extui %20 : i1 to i32
    %c0_i32_15 = arith.constant 0 : i32
    %22 = arith.cmpi ne, %21, %c0_i32_15 : i32
    scf.if %22 {
      %c0_16 = arith.constant 0 : index
      %c0_17 = arith.constant 0 : index
      %c0_18 = arith.constant 0 : index
      %23 = vector.load %arg5[%c0_16, %c0_17, %c0_18] : memref<1x1x128xf32, #tpu.memory_space<vmem>>, vector<1x1x128xf32>
      %cst_19 = arith.constant 1.562500e-02 : f32
      %24 = vector.broadcast %cst_19 : f32 to vector<1x1x128xf32>
      %25 = arith.mulf %23, %24 : vector<1x1x128xf32>
      %c0_20 = arith.constant 0 : index
      %c0_21 = arith.constant 0 : index
      %c0_22 = arith.constant 0 : index
      %26 = vector.load %arg5[%c0_20, %c0_21, %c0_22] : memref<1x1x128xf32, #tpu.memory_space<vmem>>, vector<1x1x128xf32>
      tpu.vector_store %arg5[%c0_20, %c0_21, %c0_22], %25 {strides = array<i32>} : memref<1x1x128xf32, #tpu.memory_space<vmem>>, vector<1x1x128xf32>,
    } else {
    }
    return
  }
  func.func @transform_0(%arg0: i32, %arg1: i32) -> (i32, i32, i32) {
    %c0_i32 = arith.constant 0 : i32
    %c0_i32_0 = arith.constant 0 : i32
    return %arg0, %arg1, %c0_i32 : i32, i32, i32
  }
  func.func @transform_1(%arg0: i32, %arg1: i32) -> (i32, i32) {
    %c0_i32 = arith.constant 0 : i32
    %c0_i32_0 = arith.constant 0 : i32
    %c0_i32_1 = arith.constant 0 : i32
    return %c0_i32, %c0_i32_0 : i32, i32
  }
  func.func @transform_2(%arg0: i32, %arg1: i32) -> (i32, i32) {
    %c0_i32 = arith.constant 0 : i32
    %c0_i32_0 = arith.constant 0 : i32
    %c0_i32_1 = arith.constant 0 : i32
    return %c0_i32, %c0_i32_0 : i32, i32
  }
  func.func @transform_3(%arg0: i32, %arg1: i32) -> (i32, i32, i32) {
    %c0_i32 = arith.constant 0 : i32
    %c0_i32_0 = arith.constant 0 : i32
    %c0_i32_1 = arith.constant 0 : i32
    return %arg0, %c0_i32, %c0_i32_0 : i32, i32, i32
  }
}

</mosaic_0001>

<bundles_post_ra>
// kernel: tpu_custom_call.1
= control target key start
LH: loop header
LB: loop body
LE: loop exit
PB: predicated region body
PF: predicated region fallthrough
CT: control target
= control target key end

     0   :  { %s1169_s0 = inlined_call_operand.hbm [shape: bf16[2,64,128], index: 0, kind: input, shape index: {}]   ;;  %s1170_s1 = inlined_call_operand.hbm [shape: bf16[128,128], index: 1, kind: input, shape index: {}]   ;;  %s1171_s2 = inlined_call_operand.vmem [shape: f32[1,128], index: 2, kind: input, shape index: {}]   ;;  %s1172_s3 = inlined_call_operand.hbm [shape: f32[2,1,128], index: 3, kind: output, shape index: {}]  }
   0x1   :  { %1187 = sst [smem:[#allocation16_spill]] %s1170_s1 }
   0x2   :  { %1188 = sst [smem:[#allocation17_spill]] %s1172_s3 }
   0x3   :  { %8 = vsyncpa [#allocation3], 0 }
   0x4   :  { %10 = vsyncpa [#allocation3 + $0x1], 0 }
   0x5   :  { %11 = vsyncpa [#allocation6], 0 }
   0x6   :  { %12 = vsyncpa [#allocation4], 0 }
   0x7   :  { %14 = vsyncpa [#allocation4 + $0x1], 0  ;;  %s884_s12 = smov 0   ;;  %s886_s13 = smov 0  }
   0x8   :  { %s888_s14 = smov 0   ;;  %s890_s15 = smov 0  }
   0x9   :  { %s892_s16 = smov 0   ;;  %s894_s17 = smov 0  }
   0xa   :  { %s896_s18 = smov 0   ;;  %s898_s19 = smov 0  }
   0xb   :  { %s900_s20 = smov 0   ;;  %s902_s21 = smov 0  }
   0xc   :  { %s904_s22 = smov 0  }
   0xd LB: > { %1189 = sst [smem:[#allocation11_spill]] %s816_s12  ;;  %s488_s23 = sadd.s32 4294967295, %s856_s22   ;;  %s856_s22 = sphi %s904_s22, %s20_s22   ;;  %s852_s21 = sphi %s902_s21, %s1225_s21   ;;  %s848_s20 = sphi %s900_s20, %s1224_s20   ;;  %s844_s19 = sphi %s898_s19, %s1223_s19   ;;  %s840_s18 = sphi %s896_s18, %s1222_s18   ;;  %s836_s17 = sphi %s894_s17, %s1221_s17   ;;  %s832_s16 = sphi %s892_s16, %s1220_s16   ;;  %s828_s15 = sphi %s890_s15, %s1219_s15   ;;  %s824_s14 = sphi %s888_s14, %s1218_s14   ;;  %s820_s13 = sphi %s886_s13, %s1217_s13   ;;  %s816_s12 = sphi %s884_s12, %s1216_s12  }
   0xe   : > { %s489_s24 = sadd.s32 4294967294, %s856_s22   ;;  %p54_p0 = scmp.ne.s32.totalorder %s832_s16, %s828_s15 }
   0xf   : > { %p940_p1 = scmp.eq.s32.totalorder %s488_s23, 0  ;;  %s109_s26 = sadd.s32 1, %s824_s14 }
  0x10   : > { %p119_p2 = scmp.ne.s32.totalorder %s824_s14, %s820_s13  ;;  %p120_p4 = scmp.eq.s32.totalorder %s488_s23, 3 }
  0x11   : > { %s1190_s25 = scalar_select %p940_p1, 1, 0 }
  0x12   : > { %p949_p3 = por %p940_p1, %p54_p0  ;;  %p125_p5 = scmp.ne.s32.totalorder %s820_s13, %s816_s12 }
  0x13   : > { %p126_p6 = scmp.eq.s32.totalorder %s489_s24, 3  ;;  %p955_p7 = por %p120_p4, %p119_p2 }
  0x14   : > { %s1191_s27 = scalar_select %p949_p3, 1, 0 }
  0x15   : > { %s1192_s28 = scalar_select %p955_p7, 1, 0 }
  0x16   : > { %p490_p8 = scmp.ge.s32.totalorder %s856_s22, 1  ;;  %p960_p9 = por %p126_p6, %p125_p5 }
  0x17   : > { %1193 = sst [smem:[#allocation12_spill]] %s1192_s28  ;;  %p133_p10 = scmp.lt.s32.totalorder %s856_s22, 5 }
  0x18   : > { %s1194_s29 = scalar_select %p960_p9, 1, 0 }
  0x19   : > { %p965_p11 = pnand %p490_p8, %p133_p10  ;;  %s858_s4 = smov [#allocation5]  }
  0x1a   : > { %1195 = sst [smem:[#allocation13_spill]] %s1194_s29  ;;  %s145_s5 = sshll.u32 %s858_s4, 4  ;;  %s146_s5 = int_to_ptr.vmem [resolvable:$true] %s145_s5 }
  0x1b   : > { %s1196_s30 = scalar_select %p965_p11, 1, 0 }
  0x1c   : > { %p554_p12 = pneg %p965_p11  ;;  %s1198_s1 = sld [smem:[#allocation16_spill]] }
  0x1e   : > { %p973_p13 = pnand %p554_p12, %p940_p1 }
  0x20   : > { %p674_p2 = pneg %p973_p13 }
  0x22   : > { %s672_s9 = scalar_lea.hbm %s1198_s1, 1024 }
  0x23   : > { %p673_p0 = scmp.ne.s32.totalorder %s1198_s1, %s672_s9  ;;  %p679_p6 = scmp.lt.u32.totalorder %s672_s9, %s1198_s1 }
  0x25   : > { %p675_p4 = pnand %p674_p2, %p673_p0 }
  0x27   : > { %p676_p5 = pneg %p675_p4 }
  0x29   : > { %p681_p8 = pnand %p679_p6, %p676_p5 }
  0x2b   : > { %684 = shalt.err (!%p681_p8)
}
  0x2c   : > { %s685_s24 = scalar_lea.vmem %s146_s5, 1024  ;;  %p693_p7 = scmp.lt.s32.totalorder %s146_s5, %s146_s5 }
  0x2d   : > { %p686_p10 = scmp.ne.s32.totalorder %s146_s5, %s685_s24  ;;  %p694_p1 = scmp.lt.s32.totalorder %s685_s24, %s685_s24 }
  0x2f   : > { %p688_p12 = pnand %p686_p10, %p674_p2  ;;  %p695_p3 = por %p694_p1, %p693_p7 }
  0x31   : > { %p689_p9 = pneg %p688_p12 }
  0x33   : > { %p696_p11 = pnand %p695_p3, %p689_p9 }
  0x35   : > { %699 = shalt.err (!%p696_p11)
}
  0x36   : > { %s1178_s4 = smov 64   ;;  %s1179_s7 = smov 4  }
  0x37   : > { %557 = dma.hbm_to_vmem [thread:$0]  (!%p973_p13), %s1198_s1, 1024, %s146_s5, [#allocation6], %s1178_s4, %s1178_s4, %s1179_s7  }
  0x38   : > { %s29_s10 = sadd.s32 1, %s848_s20  ;;  %s32_s11 = sadd.s32 1, %s852_s21 }
  0x39   : > { %p30_p1 = scmp.ge.s32.totalorder %s29_s10, 2  ;;  %s41_s15 = sadd.s32 1, %s836_s17 }
  0x3a   : > { %p48_p3 = scmp.ne.s32.totalorder %s836_s17, %s832_s16  ;;  %p49_p7 = scmp.eq.s32.totalorder %s856_s22, 0 }
  0x3b   : > { %s1227_s10 = smov (%p30_p1, %s29_s10), 0  ;;  %s1229_s11 = smov (!%p30_p1, %s32_s11), %s852_s21 }
  0x3c   : > { %1199 = sst [smem:[#allocation14_spill]] %s1227_s10  ;;  %s37_s6 = ssub.s32 %s848_s20, %s1227_s10 }
  0x3d   : > { %p34_p9 = scmp.ge.s32.totalorder %s1229_s11, 2  ;;  %p567_p11 = scmp.lt.s32.totalorder %s856_s22, 4 }
  0x3e   : > { %p1008_p13 = por %p49_p7, %p48_p3  ;;  %s162_s23 = sand.u32 1, %s836_s17  }
  0x3f   : > { %s1231_s11 = smov (%p34_p9, %s1229_s11), 0  ;;  %s493_s24 = sshll.u32 %s162_s23, 4 }
  0x40   : > { %1201 = sst [smem:[#allocation15_spill]] %s1231_s11  ;;  %s36_s8 = ssub.s32 %s852_s21, %s1231_s11 }
  0x41   : > { %s38_s9 = sor.u32 %s37_s6, %s36_s8  ;;  %p107_p0 = scmp.eq.s32.totalorder %s36_s8, 0 }
  0x42   : > { %p39_p2 = scmp.eq.s32.totalorder %s38_s9, 0  ;;  %s494_s4 = sshll.u32 %s848_s20, 2 }
  0x43   : > { %s1021_s7 = scalar_select %p107_p0, %s824_s14, %s109_s26  }
  0x44   : > { %s1024_s1 = scalar_select %p39_p2, %s836_s17, %s41_s15  }
  0x45   : > { %s495_s10 = sshll.u32 %s852_s21, 3  ;;  %s166_s29 = scalar_lea.vmem [#allocation2], %s493_s24 }
  0x46   : > { %s175_s12 = sshll.u32 %s166_s29, 4  ;;  %s172_s3 = sadd.s32 %s495_s10, %s494_s4  ;;  %s1027_s12 = int_to_ptr.vmem [resolvable:$true] %s175_s12 }
  0x47   : > { %s496_s28 = sshll.u32 %s172_s3, 6  ;;  %p1033_p4 = pnand %p567_p11, %p1008_p13 }
  0x48   : > { %s1040_s26 = scalar_lea.hbm %s1169_s0, %s496_s28  ;;  %s1042_s29 = scalar_lea.sflag [#allocation3], %s162_s23 }
  0x49   : > { %s700_s3 = scalar_lea.hbm %s1040_s26, 256  ;;  %p702_p6 = pneg %p1033_p4 }
  0x4a   : > { %p701_p5 = scmp.ne.s32.totalorder %s1040_s26, %s700_s3  ;;  %s705_s15 = scalar_lea.hbm %s1169_s0, 1024 }
  0x4b   : > { %p706_p12 = scmp.lt.u32.totalorder %s1040_s26, %s1169_s0  ;;  %p707_p1 = scmp.lt.u32.totalorder %s705_s15, %s700_s3 }
  0x4c   : > { %p703_p8 = pnand %p702_p6, %p701_p5  ;;  %p709_p7 = scmp.lt.u32.totalorder %s700_s3, %s1040_s26 }
  0x4d   : > { %p708_p3 = por %p707_p1, %p706_p12 }
  0x4e   : > { %p704_p10 = pneg %p703_p8 }
  0x4f   : > { %p710_p9 = por %p709_p7, %p708_p3 }
  0x51   : > { %p711_p11 = pnand %p710_p9, %p704_p10 }
  0x53   : > { %714 = shalt.err (!%p711_p11)
}
  0x54   : > { %s715_s23 = scalar_lea.vmem %s1027_s12, 256  ;;  %s861_s24 = smov [#allocation2]  }
  0x55   : > { %p716_p13 = scmp.ne.s32.totalorder %s1027_s12, %s715_s23  ;;  %s720_s9 = sshll.u32 %s861_s24, 4  ;;  %s721_s9 = int_to_ptr.vmem [resolvable:$false] %s720_s9 }
  0x56   : > { %s722_s6 = scalar_lea.vmem %s721_s9, 512  ;;  %p723_p5 = scmp.lt.s32.totalorder %s1027_s12, %s721_s9 }
  0x57   : > { %p718_p0 = pnand %p716_p13, %p702_p6  ;;  %p724_p8 = scmp.lt.s32.totalorder %s722_s6, %s715_s23 }
  0x59   : > { %p719_p2 = pneg %p718_p0  ;;  %p725_p12 = por %p724_p8, %p723_p5 }
  0x5b   : > { %p726_p1 = pnand %p725_p12, %p719_p2 }
  0x5d   : > { %729 = shalt.err (!%p726_p1)
}
  0x5e   : > { %s1203_s8 = smov 4   ;;  %s1204_s3 = smov 64  }
  0x5f   : > { %561 = dma.hbm_to_vmem [thread:$0]  (!%p1033_p4), %s1040_s26, 256, %s1027_s12, %s1042_s29, %s1204_s3, %s1204_s3, %s1203_s8  }
  0x60   : > { %p1205_p6 = scmp.ne.s32.totalorder %s1196_s30, 0 }
  0x61   : > { %s189_s4 = sand.u32 (!%p1205_p6), 1, %s832_s16   ;;  %p1206_p10 = scmp.ne.s32.totalorder (!%p1205_p6), %s1191_s27, 0 }
  0x62   : > { %187 = sbr.rel (%p1205_p6) target bundleno = 428 (0x1ac), region = 32  ;;  %s1076_s10 = sshll.u32 (!%p1205_p6), %s189_s4, 4 }
  0x63   : > { %s190_s15 = scalar_lea.sflag (!%p1205_p6), [#allocation3], %s189_s4  ;;  %s193_s28 = scalar_lea.vmem (!%p1205_p6), [#allocation2], %s1076_s10 }
  0x69   : > { %803 = dma.done.wait (%p1206_p10), %s190_s15, 256  }
  0x6a   : > { %805 = vsyncadd (%p1206_p10), %s190_s15, 4294967040  ;;  %p1207_p3 = scmp.ne.s32.totalorder %s1190_s25, 0 }
  0x6c   : > { %807 = dma.done.wait (%p1207_p3), [#allocation6], 1024  }
  0x6d   : > { %809 = vsyncadd (%p1207_p3), [#allocation6], 4294966272  ;;  %s217_s12 = sand.u32 1, %s820_s13   ;;  %p500_p4 = scmp.ne.s32.totalorder %s840_s18, 0 }
  0x6e   : > { %s1090_s30 = scalar_lea.vmem [#allocation7], %s217_s12  ;;  %v862_v0 = vmov (!%p500_p4), 0.0  }
  0x6f   : > { %224 = sbr.rel (%p500_p4) target bundleno = 118 (0x76), region = 44  ;;  %225 = vst [vmem:[%s1090_s30] sm:$0x1] (!%p500_p4), %v862_v0 }
  0x76 PF: > { %v662_v1 = vld [vmem:[#allocation5] sm:$0xff]   ;;  %v663_v2 = vld [vmem:[#allocation5 + $0x8] sm:$0xff]   ;;  %v664_v3 = vld [vmem:[#allocation5 + $0x10] sm:$0xff]   ;;  %p512_p7 = scmp.ne.s32.totalorder %s840_s18, 1 }
  0x77   : > { %526 = vmatprep.subr.bf16.mxu0 %v662_v1  ;;  %v665_v4 = vld [vmem:[#allocation5 + $0x18] sm:$0xff]   ;;  %v670_v5 = vld [vmem:[%s193_s28] sm:$0xff]   ;;  %v667_v7 = vld [vmem:[#allocation5 + $0x28] sm:$0xff]  }
  0x78   : > { %527 = vmatpush3.bf16.msra.mxu0 %v662_v1  ;;  %542 = vmatprep.mubr.bf16.mxu0 %v670_v5  ;;  %v666_v6 = vld [vmem:[#allocation5 + $0x20] sm:$0xff]   ;;  %v668_v8 = vld [vmem:[#allocation5 + $0x30] sm:$0xff]   ;;  %v669_v9 = vld [vmem:[#allocation5 + $0x38] sm:$0xff]  }
  0x79   : > { %528 = vmatprep.subr.bf16.mxu0 %v663_v2  ;;  %v671_v10 = vld [vmem:[%s193_s28 + $0x8] sm:$0xff]   ;;  %v501_v11 = vld [vmem:[%s1171_s2] ss:$0 sm:$0xff] }
  0x7a   : > { %v366_v32 = vld [vmem:[%s1090_s30] sm:$0x1] }
  0x7c   : > { %529 = vmatpush3.bf16.msra.mxu0 %v663_v2 }
  0x7d   : > { %530 = vmatprep.subr.bf16.mxu0 %v664_v3 }
  0x80   : > { %531 = vmatpush3.bf16.msra.mxu0 %v664_v3 }
  0x81   : > { %532 = vmatprep.subr.bf16.mxu0 %v665_v4 }
  0x84   : > { %533 = vmatpush3.bf16.msra.mxu0 %v665_v4 }
  0x85   : > { %534 = vmatprep.subr.bf16.mxu0 %v666_v6 }
  0x88   : > { %535 = vmatpush3.bf16.msra.mxu0 %v666_v6 }
  0x89   : > { %536 = vmatprep.subr.bf16.mxu0 %v667_v7 }
  0x8c   : > { %537 = vmatpush3.bf16.msra.mxu0 %v667_v7 }
  0x8d   : > { %538 = vmatprep.subr.bf16.mxu0 %v668_v8 }
  0x90   : > { %539 = vmatpush3.bf16.msra.mxu0 %v668_v8 }
  0x91   : > { %540 = vmatprep.subr.bf16.mxu0 %v669_v9 }
  0x94   : > { %541 = vmatpush3.bf16.msra.mxu0 %v669_v9 }
  0x97   : > { %543 = vmatmul.mubr.bf16.vlgmr.msra.gmra.mrb[0].mxu0 %v671_v10 }
 0x16a   : > { %v544_v12 = vpop.f32.mrb[0].mxu0 }
 0x16b   : > { %v347_v13 = vpop.f32.mrb[1].mxu0  ;;  %v356_v17 = vadd.f32 %v544_v12, %v501_v11 }
 0x16c   : > { %v348_v14 = vadd.f32 %v501_v11, %v347_v13  ;;  %v545_v15 = vpop.f32.mrb[2].mxu0 }
 0x16d   : > { %v350_v16 = vpop.f32.mrb[3].mxu0  ;;  %v359_v20 = vadd.f32 %v545_v15, %v501_v11  ;;  %v364_v22 = vmax.f32 %v356_v17, 0.0 }
 0x16e   : > { %v351_v18 = vadd.f32 %v501_v11, %v350_v16  ;;  %v362_v19 = vmax.f32 %v348_v14, 0.0 }
 0x16f   : > { %v365_v24 = vmax.f32 %v359_v20, 0.0 }
 0x170   : > { %v363_v21 = vmax.f32 %v351_v18, 0.0 }
 0x172   : > { %v367_v23 = vadd.f32 %v363_v21, %v362_v19 }
 0x174   : > { %v368_v25 = vadd.f32 %v367_v23, %v364_v22 }
 0x176   : > { %v369_v26 = vadd.f32 %v368_v25, %v365_v24 }
 0x178   : > { %v370_v27 = vrot.slane %v369_v26, 4 }
 0x17a   : > { %v371_v28 = vadd.f32 %v370_v27, %v369_v26 }
 0x17c   : > { %v372_v29 = vrot.slane %v371_v28, 2 }
 0x17e   : > { %v373_v30 = vadd.f32 %v372_v29, %v371_v28 }
 0x180   : > { %v374_v31 = vrot.slane %v373_v30, 1  ;;  %381 = sbr.rel (%p512_p7) target bundleno = 401 (0x191), region = 48 }
 0x182   : > { %v375_v33 = vadd.f32 %v374_v31, %v373_v30 }
 0x184   : > { %v376_v34 = vadd.f32 %v375_v33, %v366_v32 }
 0x186   : > { %377 = vst [vmem:[%s1090_s30] sm:$0x1] %v376_v34 }
 0x18d   : > { %v382_v35 = vld [vmem:[%s1090_s30] sm:$0x1] }
 0x18e   : > { %v383_v36 = vmul.f32 0.015625, %v382_v35 }
 0x190   : > { %384 = vst [vmem:[%s1090_s30] sm:$0x1] %v383_v36 }
 0x191 PF: > { %s1208_s11 = sld [smem:[#allocation12_spill]]  ;;  %s513_s26 = sshll.u32 %s844_s19, 4 }
 0x192   : > { %s1209_s23 = sld [smem:[#allocation17_spill]]  ;;  %s398_s9 = sshll.u32 %s1090_s30, 4  ;;  %s399_s9 = int_to_ptr.vmem [resolvable:$true] %s398_s9 }
 0x193   : > { %s386_s18 = scalar_lea.sflag [#allocation4], %s217_s12  ;;  %s730_s6 = scalar_lea.vmem %s399_s9, 16 }
 0x194   : > { %p731_p9 = scmp.ne.s32.totalorder %s399_s9, %s730_s6  ;;  %s863_s8 = smov [#allocation7]  }
 0x195   : > { %s734_s3 = sshll.u32 %s863_s8, 4  ;;  %s735_s3 = int_to_ptr.vmem [resolvable:$false] %s734_s3 }
 0x196   : > { %s736_s4 = scalar_lea.vmem %s735_s3, 32  ;;  %p737_p2 = scmp.lt.s32.totalorder %s399_s9, %s735_s3 }
 0x197   : > { %p1210_p11 = scmp.ne.s32.totalorder %s1208_s11, 0  ;;  %p738_p5 = scmp.lt.s32.totalorder %s736_s4, %s730_s6 }
 0x198   : > { %s1110_s24 = scalar_lea.hbm %s1209_s23, %s513_s26 }
 0x199   : > { %p732_p13 = pnand %p731_p9, %p1210_p11  ;;  %p739_p8 = por %p738_p5, %p737_p2 }
 0x19b   : > { %p733_p0 = pneg %p732_p13 }
 0x19d   : > { %p740_p12 = pnand %p739_p8, %p733_p0 }
 0x19f   : > { %743 = shalt.err (!%p740_p12)
}
 0x1a0   : > { %s744_s19 = scalar_lea.hbm %s1110_s24, 16  ;;  %s748_s28 = scalar_lea.hbm %s1209_s23, 32 }
 0x1a1   : > { %p745_p1 = scmp.ne.s32.totalorder %s1110_s24, %s744_s19  ;;  %p749_p3 = scmp.lt.u32.totalorder %s1110_s24, %s1209_s23 }
 0x1a2   : > { %p750_p4 = scmp.lt.u32.totalorder %s748_s28, %s744_s19  ;;  %p752_p9 = scmp.lt.u32.totalorder %s744_s19, %s1110_s24 }
 0x1a3   : > { %p746_p6 = pnand %p745_p1, %p1210_p11 }
 0x1a4   : > { %p751_p7 = por %p750_p4, %p749_p3 }
 0x1a5   : > { %p747_p10 = pneg %p746_p6 }
 0x1a6   : > { %p753_p13 = por %p752_p9, %p751_p7 }
 0x1a8   : > { %p754_p0 = pnand %p753_p13, %p747_p10 }
 0x1aa   : > { %757 = shalt.err (!%p754_p0)
}
 0x1ab   : > { %552 = dma.vmem_to_hbm [thread:$0]  (%p1210_p11), %s399_s9, 16, %s1110_s24, %s386_s18  }
 0x1ac PF: > { %s1211_s25 = sld [smem:[#allocation11_spill]]  ;;  %s1212_s27 = sld [smem:[#allocation13_spill]] }
 0x1ad   : > { %p569_p2 = scmp.ge.s32.totalorder %s856_s22, 2 }
 0x1b2   : > { %s410_s26 = sand.u32 1, %s1211_s25   ;;  %p1213_p5 = scmp.ne.s32.totalorder %s1212_s27, 0 }
 0x1b3   : > { %s411_s29 = scalar_lea.sflag [#allocation4], %s410_s26 }
 0x1b4   : > { %p563_p8 = pnand %p569_p2, %p1213_p5 }
 0x1b6   : > { %811 = dma.done.wait (!%p563_p8), %s411_s29, 16  }
 0x1b7   : > { %813 = vsyncadd (!%p563_p8), %s411_s29, 4294967280  ;;  %s20_s22 = sadd.s32 1, %s856_s22   ;;  %s1214_s11 = sld [smem:[#allocation14_spill]] }
 0x1b8   : > { %p17_p12 = scmp.ge.s32.totalorder %s20_s22, 6   ;;  %s1215_s5 = sld [smem:[#allocation15_spill]] }
 0x1b9   : > { %s1216_s12 = smov %s820_s13  ;;  %s1217_s13 = smov %s824_s14 }
 0x1ba   : > { %s1218_s14 = smov %s1021_s7  ;;  %s1219_s15 = smov %s832_s16 }
 0x1bb   : > { %s1220_s16 = smov %s836_s17  ;;  %s1221_s17 = smov %s1024_s1 }
 0x1bc   : > { %s1222_s18 = smov %s848_s20  ;;  %s1223_s19 = smov %s852_s21 }
 0x1bd   : > { %s1224_s20 = smov %s1214_s11  ;;  %19 = sbr.rel (!%p17_p12) target bundleno = 13 (0xd), region = 89 }
 0x1be   : > { %s1225_s21 = smov %s1215_s5 }
 0x1c4   :  { %415 = vsyncpa [#allocation3], 1 }
 0x1c5   :  { %417 = vsyncpa [#allocation3 + $0x1], 1 }
 0x1c6   :  { %418 = vsyncpa [#allocation6], 1 }
 0x1c7   :  { %419 = vsyncpa [#allocation4], 1 }
 0x1c8   :  { %421 = vsyncpa [#allocation4 + $0x1], 1 }

</bundles_post_ra>
